<compile_context>
chip_gen: v6e
topology: v6e:2x2x1
jax: 0.10.0
libtpu: 0.0.40
codegen_flags: <defaults>
</compile_context>

<pallas_src>
import jax
import jax.numpy as jnp
from jax.experimental import pallas as pl
from jax.experimental.pallas import tpu as pltpu


Z_DIM = 100
HIDDEN = 128
OUT_DIM = 784          # 28 * 28
TM_MAX = 1024          # batch tile (f32); ~6.3 MiB/out double-buffer at 1024


def _cdiv(a, b):
    return (a + b - 1) // b


def _round_up(n, m):
    return _cdiv(n, m) * m


def _generator_kernel(x_ref, w1_ref, b1_ref, w2_ref, b2_ref, out_ref):
    # fc1: (TM, Z) @ (Z, H) + (1, H)
    h = jnp.dot(x_ref[...], w1_ref[...], preferred_element_type=jnp.float32)
    h = h + b1_ref[...]
    # LeakyReLU(0.2)
    h = jnp.where(h > 0, h, 0.2 * h)
    # fc2: (TM, H) @ (H, OUT) + (1, OUT)
    o = jnp.dot(h, w2_ref[...], preferred_element_type=jnp.float32)
    o = o + b2_ref[...]
    # tanh, stored lane-dense straight to the (TM, 784) output block
    out_ref[...] = jnp.tanh(o).astype(out_ref.dtype)


def generator_forward(x, w1, b1, w2, b2):
    """x: (B, Z_DIM) float32 -> (B, 1, 28, 28) float32."""
    B = x.shape[0]

    # --- batch tiling: minimize padding waste, keep >=2 grid steps for v7x ---
    n_tiles = max(1, _cdiv(B, TM_MAX))
    if B >= 64 and n_tiles < 2:
        n_tiles = 2                    # let megacore shard the batch axis
    TM = _round_up(_cdiv(B, n_tiles), 8)
    Bp = _round_up(B, TM)
    if Bp != B:
        # single fused pad over x only when the batch needs rounding up
        x = jnp.pad(x, ((0, Bp - B), (0, 0)))

    grid = (Bp // TM,)

    flops = 2 * Bp * (Z_DIM * HIDDEN + HIDDEN * OUT_DIM)
    transcendentals = Bp * OUT_DIM     # tanh
    bytes_accessed = 4 * (
        Bp * Z_DIM                     # x in
        + Z_DIM * HIDDEN + HIDDEN      # w1, b1
        + HIDDEN * OUT_DIM + OUT_DIM   # w2, b2
        + Bp * OUT_DIM                 # out
    )

    out_flat = pl.pallas_call(
        _generator_kernel,
        out_shape=jax.ShapeDtypeStruct((Bp, OUT_DIM), jnp.float32),
        grid=grid,
        in_specs=[
            pl.BlockSpec((TM, Z_DIM), lambda i: (i, 0)),         # x: tiled on batch
            pl.BlockSpec((Z_DIM, HIDDEN), lambda i: (0, 0)),     # w1: VMEM-resident
            pl.BlockSpec((1, HIDDEN), lambda i: (0, 0)),         # b1: VMEM-resident
            pl.BlockSpec((HIDDEN, OUT_DIM), lambda i: (0, 0)),   # w2: VMEM-resident
            pl.BlockSpec((1, OUT_DIM), lambda i: (0, 0)),        # b2: VMEM-resident
        ],
        out_specs=pl.BlockSpec((TM, OUT_DIM), lambda i: (i, 0)),
        compiler_params=pltpu.CompilerParams(
            dimension_semantics=("parallel",),
        ),
        cost_estimate=pl.CostEstimate(
            flops=flops,
            transcendentals=transcendentals,
            bytes_accessed=bytes_accessed,
        ),
    )(x, w1, b1, w2, b2)

    # drop batch padding (no-op when Bp == B), then view(B, 1, 28, 28).
    return out_flat[:B].reshape(B, 1, 28, 28)


def init_params(key):
    """Deterministic init mimicking nn.Linear's U(-1/sqrt(fan_in), 1/sqrt(fan_in))."""
    k1, k2, k3, k4 = jax.random.split(key, 4)
    lim1 = 1.0 / (Z_DIM ** 0.5)
    lim2 = 1.0 / (HIDDEN ** 0.5)
    w1 = jax.random.uniform(k1, (Z_DIM, HIDDEN), jnp.float32, -lim1, lim1)
    b1 = jax.random.uniform(k2, (1, HIDDEN), jnp.float32, -lim1, lim1)
    w2 = jax.random.uniform(k3, (HIDDEN, OUT_DIM), jnp.float32, -lim2, lim2)
    b2 = jax.random.uniform(k4, (1, OUT_DIM), jnp.float32, -lim2, lim2)
    return w1, b1, w2, b2


def _reference_forward(x, w1, b1, w2, b2):
    h = x @ w1 + b1
    h = jnp.where(h > 0, h, 0.2 * h)
    o = jnp.tanh(h @ w2 + b2)
    return o.reshape(x.shape[0], 1, 28, 28)


if __name__ == "__main__":
    key = jax.random.PRNGKey(0)
    k_params, k_z = jax.random.split(key)
    w1, b1, w2, b2 = init_params(k_params)

    # f = torch.randn(8, 100)
    f = jax.random.normal(k_z, (8, Z_DIM), dtype=jnp.float32)

    out = generator_forward(f, w1, b1, w2, b2)
    out = jax.block_until_ready(out)

    ref = _reference_forward(f, w1, b1, w2, b2)
    assert out.shape == (8, 1, 28, 28), out.shape
    assert jnp.allclose(out, ref, atol=1e-5, rtol=1e-5), "mismatch vs reference"

    print("KERNEL_OK")
</pallas_src>

<mosaic_0001>
module attributes {stable_mosaic.version = 11 : i64} {
  func.func @_generator_kernel(%arg0: i32, %arg1: memref<8x100xf32, #tpu.memory_space<vmem>>, %arg2: memref<100x128xf32, #tpu.memory_space<vmem>>, %arg3: memref<1x128xf32, #tpu.memory_space<vmem>>, %arg4: memref<128x784xf32, #tpu.memory_space<vmem>>, %arg5: memref<1x784xf32, #tpu.memory_space<vmem>>, %arg6: memref<8x784xf32, #tpu.memory_space<vmem>>) attributes {dimension_semantics = [#tpu.dimension_semantics<parallel>], iteration_bounds = array<i64: 1>, scalar_prefetch = 0 : i64, scratch_operands = 0 : i64, tpu.core_type = #tpu.core_type<tc>, window_params = [{transform_indices = @transform_0, window_bounds = array<i64: 8, 100>}, {pipeline_mode = #tpu.pipeline_mode<synchronous>, transform_indices = @transform_1, window_bounds = array<i64: 100, 128>}, {pipeline_mode = #tpu.pipeline_mode<synchronous>, transform_indices = @transform_2, window_bounds = array<i64: 1, 128>}, {pipeline_mode = #tpu.pipeline_mode<synchronous>, transform_indices = @transform_3, window_bounds = array<i64: 128, 784>}, {pipeline_mode = #tpu.pipeline_mode<synchronous>, transform_indices = @transform_4, window_bounds = array<i64: 1, 784>}, {transform_indices = @transform_5, window_bounds = array<i64: 8, 784>}]} {
    %c0 = arith.constant 0 : index
    %c0_0 = arith.constant 0 : index
    %0 = vector.load %arg1[%c0, %c0_0] : memref<8x100xf32, #tpu.memory_space<vmem>>, vector<8x100xf32>
    %c0_1 = arith.constant 0 : index
    %c0_2 = arith.constant 0 : index
    %1 = vector.load %arg2[%c0_1, %c0_2] : memref<100x128xf32, #tpu.memory_space<vmem>>, vector<100x128xf32>
    %cst = arith.constant dense<0.000000e+00> : vector<8x128xf32>
    %2 = tpu.matmul %0, %1, %cst {dimension_numbers = #tpu.dot_dimension_numbers<[1], [0], [0], [1], [0, 0, 1, 1], [], []>} : vector<8x100xf32>, vector<100x128xf32>, vector<8x128xf32> -> vector<8x128xf32>
    %c0_3 = arith.constant 0 : index
    %c0_4 = arith.constant 0 : index
    %3 = vector.load %arg3[%c0_3, %c0_4] : memref<1x128xf32, #tpu.memory_space<vmem>>, vector<1x128xf32>
    %4 = vector.broadcast %3 : vector<1x128xf32> to vector<8x128xf32>
    %5 = arith.addf %2, %4 : vector<8x128xf32>
    %cst_5 = arith.constant 0.000000e+00 : f32
    %6 = vector.broadcast %cst_5 : f32 to vector<8x128xf32>
    %7 = arith.cmpf ogt, %5, %6 : vector<8x128xf32>
    %cst_6 = arith.constant 2.000000e-01 : f32
    %8 = vector.broadcast %cst_6 : f32 to vector<8x128xf32>
    %9 = arith.mulf %8, %5 : vector<8x128xf32>
    %10 = arith.select %7, %5, %9 : vector<8x128xi1>, vector<8x128xf32>
    %c0_7 = arith.constant 0 : index
    %c0_8 = arith.constant 0 : index
    %11 = vector.load %arg4[%c0_7, %c0_8] : memref<128x784xf32, #tpu.memory_space<vmem>>, vector<128x784xf32>
    %cst_9 = arith.constant dense<0.000000e+00> : vector<8x784xf32>
    %12 = tpu.matmul %10, %11, %cst_9 {dimension_numbers = #tpu.dot_dimension_numbers<[1], [0], [0], [1], [0, 0, 1, 1], [], []>} : vector<8x128xf32>, vector<128x784xf32>, vector<8x784xf32> -> vector<8x784xf32>
    %c0_10 = arith.constant 0 : index
    %c0_11 = arith.constant 0 : index
    %13 = vector.load %arg5[%c0_10, %c0_11] : memref<1x784xf32, #tpu.memory_space<vmem>>, vector<1x784xf32>
    %14 = vector.broadcast %13 : vector<1x784xf32> to vector<8x784xf32>
    %15 = arith.addf %12, %14 : vector<8x784xf32>
    %16 = math.tanh %15 : vector<8x784xf32>
    %c0_12 = arith.constant 0 : index
    %c0_13 = arith.constant 0 : index
    %17 = vector.load %arg6[%c0_12, %c0_13] : memref<8x784xf32, #tpu.memory_space<vmem>>, vector<8x784xf32>
    tpu.vector_store %arg6[%c0_12, %c0_13], %16 {strides = array<i32>} : memref<8x784xf32, #tpu.memory_space<vmem>>, vector<8x784xf32>,
    return
  }
  func.func @transform_0(%arg0: i32) -> (i32, i32) {
    %c0_i32 = arith.constant 0 : i32
    %c0_i32_0 = arith.constant 0 : i32
    return %arg0, %c0_i32 : i32, i32
  }
  func.func @transform_1(%arg0: i32) -> (i32, i32) {
    %c0_i32 = arith.constant 0 : i32
    %c0_i32_0 = arith.constant 0 : i32
    %c0_i32_1 = arith.constant 0 : i32
    return %c0_i32, %c0_i32_0 : i32, i32
  }
  func.func @transform_2(%arg0: i32) -> (i32, i32) {
    %c0_i32 = arith.constant 0 : i32
    %c0_i32_0 = arith.constant 0 : i32
    %c0_i32_1 = arith.constant 0 : i32
    return %c0_i32, %c0_i32_0 : i32, i32
  }
  func.func @transform_3(%arg0: i32) -> (i32, i32) {
    %c0_i32 = arith.constant 0 : i32
    %c0_i32_0 = arith.constant 0 : i32
    %c0_i32_1 = arith.constant 0 : i32
    return %c0_i32, %c0_i32_0 : i32, i32
  }
  func.func @transform_4(%arg0: i32) -> (i32, i32) {
    %c0_i32 = arith.constant 0 : i32
    %c0_i32_0 = arith.constant 0 : i32
    %c0_i32_1 = arith.constant 0 : i32
    return %c0_i32, %c0_i32_0 : i32, i32
  }
  func.func @transform_5(%arg0: i32) -> (i32, i32) {
    %c0_i32 = arith.constant 0 : i32
    %c0_i32_0 = arith.constant 0 : i32
    return %arg0, %c0_i32 : i32, i32
  }
}

</mosaic_0001>

<bundles_post_ra>
// kernel: tpu_custom_call.1
= control target key start
LH: loop header
LB: loop body
LE: loop exit
PB: predicated region body
PF: predicated region fallthrough
CT: control target
= control target key end

     0   :  { %vm46_vm0 = vcmask 1043456   ;;  %v721_v1 = vmov 0.0   ;;  %vm722_vm1 = vmmov 0   ;;  %s1183_s0 = inlined_call_operand.vmem [shape: f32[8,100], index: 0, kind: input, shape index: {}]   ;;  %s1184_s1 = inlined_call_operand.vmem [shape: f32[100,128], index: 1, kind: input, shape index: {}]   ;;  %s1185_s2 = inlined_call_operand.vmem [shape: f32[1,128], index: 2, kind: input, shape index: {}]   ;;  %s1186_s3 = inlined_call_operand.vmem [shape: f32[128,784], index: 3, kind: input, shape index: {}]   ;;  %s1187_s4 = inlined_call_operand.vmem [shape: f32[1,784], index: 4, kind: input, shape index: {}]   ;;  %s1188_s5 = inlined_call_operand.hbm [shape: f32[8,784], index: 5, kind: output, shape index: {}]  }
   0x1   :  { %v34_v0 = vld [vmem:[%s1184_s1 + $0x60] sm:$0xf]  ;;  %618 = vmatprep.subr.mxu0 %v721_v1  ;;  %v33_v2 = vld [vmem:[%s1184_s1 + $0x58] sm:$0xff]  ;;  %336 = vmatprep.mubr.f32.mxu1 %v721_v1  ;;  %v32_v3 = vld [vmem:[%s1184_s1 + $0x50] sm:$0xff] }
   0x2   :  { %619 = vmatpush3.msk.msra.mxu0 %vm46_vm0, %v34_v0  ;;  %644 = vmatprep.mubr.msk.f32.mxu0 %vm722_vm1, %v721_v1  ;;  %v229_v4 = vld [vmem:[%s1186_s3 + $0x350] sm:$0xff]  ;;  %v31_v5 = vld [vmem:[%s1184_s1 + $0x48] sm:$0xff]  ;;  %v222_v7 = vld [vmem:[%s1186_s3 + $0x318] sm:$0xff] }
   0x3   :  { %620 = vmatprep.subr.mxu0 %v721_v1  ;;  %272 = vmatprep.subr.mxu1 %v229_v4  ;;  %v228_v6 = vld [vmem:[%s1186_s3 + $0x348] sm:$0xff]  ;;  %v221_v8 = vld [vmem:[%s1186_s3 + $0x310] sm:$0xff]  ;;  %v30_v9 = vld [vmem:[%s1184_s1 + $0x40] sm:$0xff] }
   0x4   :  { %621 = vmatpush3.msra.mxu0 %v33_v2  ;;  %273 = vmatpush1.msra.mxu1 %v228_v6  ;;  %v215_v10 = vld [vmem:[%s1186_s3 + $0x2e0] sm:$0xff]  ;;  %v214_v11 = vld [vmem:[%s1186_s3 + $0x2d8] sm:$0xff]  ;;  %v208_v12 = vld [vmem:[%s1186_s3 + $0x2a8] sm:$0xff] }
   0x5   :  { %622 = vmatprep.subr.mxu0 %v721_v1  ;;  %274 = vmatprep.subr.mxu1 %v222_v7  ;;  %v29_v13 = vld [vmem:[%s1184_s1 + $0x38] sm:$0xff]  ;;  %v207_v14 = vld [vmem:[%s1186_s3 + $0x2a0] sm:$0xff]  ;;  %v201_v15 = vld [vmem:[%s1186_s3 + $0x270] sm:$0xff] }
   0x6   :  { %623 = vmatpush3.msra.mxu0 %v32_v3  ;;  %275 = vmatpush1.msra.mxu1 %v221_v8  ;;  %v28_v16 = vld [vmem:[%s1184_s1 + $0x30] sm:$0xff]  ;;  %v200_v17 = vld [vmem:[%s1186_s3 + $0x268] sm:$0xff]  ;;  %v194_v18 = vld [vmem:[%s1186_s3 + $0x238] sm:$0xff] }
   0x7   :  { %624 = vmatprep.subr.mxu0 %v721_v1  ;;  %276 = vmatprep.subr.mxu1 %v215_v10  ;;  %v27_v19 = vld [vmem:[%s1184_s1 + $0x28] sm:$0xff]  ;;  %v193_v20 = vld [vmem:[%s1186_s3 + $0x230] sm:$0xff]  ;;  %v187_v21 = vld [vmem:[%s1186_s3 + $0x200] sm:$0xff] }
   0x8   :  { %625 = vmatpush3.msra.mxu0 %v31_v5  ;;  %277 = vmatpush1.msra.mxu1 %v214_v11  ;;  %v26_v22 = vld [vmem:[%s1184_s1 + $0x20] sm:$0xff]  ;;  %v186_v23 = vld [vmem:[%s1186_s3 + $0x1f8] sm:$0xff]  ;;  %v180_v24 = vld [vmem:[%s1186_s3 + $0x1c8] sm:$0xff] }
   0x9   :  { %626 = vmatprep.subr.mxu0 %v721_v1  ;;  %278 = vmatprep.subr.mxu1 %v208_v12  ;;  %v25_v25 = vld [vmem:[%s1184_s1 + $0x18] sm:$0xff]  ;;  %v179_v26 = vld [vmem:[%s1186_s3 + $0x1c0] sm:$0xff]  ;;  %v173_v27 = vld [vmem:[%s1186_s3 + $0x190] sm:$0xff] }
   0xa   :  { %627 = vmatpush3.msra.mxu0 %v30_v9  ;;  %279 = vmatpush1.msra.mxu1 %v207_v14  ;;  %v24_v28 = vld [vmem:[%s1184_s1 + $0x10] sm:$0xff]  ;;  %v172_v29 = vld [vmem:[%s1186_s3 + $0x188] sm:$0xff]  ;;  %v166_v30 = vld [vmem:[%s1186_s3 + $0x158] sm:$0xff] }
   0xb   :  { %628 = vmatprep.subr.mxu0 %v721_v1  ;;  %280 = vmatprep.subr.mxu1 %v201_v15  ;;  %v23_v31 = vld [vmem:[%s1184_s1 + $0x8] sm:$0xff]  ;;  %v165_v32 = vld [vmem:[%s1186_s3 + $0x150] sm:$0xff]  ;;  %v159_v33 = vld [vmem:[%s1186_s3 + $0x120] sm:$0xff] }
   0xc   :  { %629 = vmatpush3.msra.mxu0 %v29_v13  ;;  %281 = vmatpush1.msra.mxu1 %v200_v17  ;;  %v22_v34 = vld [vmem:[%s1184_s1] sm:$0xff]  ;;  %v158_v35 = vld [vmem:[%s1186_s3 + $0x118] sm:$0xff] }
   0xd   :  { %630 = vmatprep.subr.mxu0 %v721_v1  ;;  %282 = vmatprep.subr.mxu1 %v194_v18 }
   0xe   :  { %631 = vmatpush3.msra.mxu0 %v28_v16  ;;  %283 = vmatpush1.msra.mxu1 %v193_v20 }
   0xf   :  { %632 = vmatprep.subr.mxu0 %v721_v1  ;;  %284 = vmatprep.subr.mxu1 %v187_v21 }
  0x10   :  { %633 = vmatpush3.msra.mxu0 %v27_v19  ;;  %285 = vmatpush1.msra.mxu1 %v186_v23 }
  0x11   :  { %634 = vmatprep.subr.mxu0 %v721_v1  ;;  %286 = vmatprep.subr.mxu1 %v180_v24 }
  0x12   :  { %635 = vmatpush3.msra.mxu0 %v26_v22  ;;  %287 = vmatpush1.msra.mxu1 %v179_v26 }
  0x13   :  { %636 = vmatprep.subr.mxu0 %v721_v1  ;;  %288 = vmatprep.subr.mxu1 %v173_v27 }
  0x14   :  { %637 = vmatpush3.msra.mxu0 %v25_v25  ;;  %289 = vmatpush1.msra.mxu1 %v172_v29 }
  0x15   :  { %638 = vmatprep.subr.mxu0 %v721_v1  ;;  %290 = vmatprep.subr.mxu1 %v166_v30 }
  0x16   :  { %639 = vmatpush3.msra.mxu0 %v24_v28 }
  0x17   :  { %640 = vmatprep.subr.mxu0 %v721_v1 }
  0x18   :  { %10 = vsyncpa [#allocation3], 0  ;;  %641 = vmatpush3.msra.mxu0 %v23_v31  ;;  %v21_v36 = vld [vmem:[%s1183_s0] sm:$0xff]  ;;  %vm42_vm2 = vcmask 818176   ;;  %291 = vmatpush1.msra.mxu1 %v165_v32  ;;  %v230_v38 = vld [vmem:[%s1186_s3 + $0x358] sm:$0xff]  ;;  %vm568_vm4 = vcmask 130048  }
  0x19   :  { %v231_v37 = vld [vmem:[%s1186_s3 + $0x360] sm:$0xff]  ;;  %642 = vmatprep.subr.mxu0 %v721_v1  ;;  %292 = vmatprep.subr.mxu1 %v159_v33  ;;  %v152_v39 = vld [vmem:[%s1186_s3 + $0xe8] sm:$0xff]  ;;  %v145_v43 = vld [vmem:[%s1186_s3 + $0xb0] sm:$0xff] }
  0x1a   :  { %643 = vmatpush3.msra.mxu0 %v22_v34  ;;  %v224_v40 = vld [vmem:[%s1186_s3 + $0x328] sm:$0xff]  ;;  %293 = vmatpush1.msra.mxu1 %v158_v35  ;;  %v151_v41 = vld [vmem:[%s1186_s3 + $0xe0] sm:$0xff]  ;;  %v217_v44 = vld [vmem:[%s1186_s3 + $0x2f0] sm:$0xff] }
  0x1b   :  { %645 = vmatmul.mubr.msk.f32.vlgmr.msra.gmra.mxu0 %vm42_vm2, %v21_v36  ;;  %343 = vmatprep.subr.mxu0 %v231_v37  ;;  %v223_v42 = vld [vmem:[%s1186_s3 + $0x320] sm:$0xff]  ;;  %v144_v45 = vld [vmem:[%s1186_s3 + $0xa8] sm:$0xff]  ;;  %v138_v47 = vld [vmem:[%s1186_s3 + $0x78] sm:$0xff] }
  0x1c   :  { %344 = vmatpush1.msra.mxu0 %v230_v38  ;;  %294 = vmatprep.subr.mxu1 %v152_v39  ;;  %v216_v46 = vld [vmem:[%s1186_s3 + $0x2e8] sm:$0xff]  ;;  %v210_v48 = vld [vmem:[%s1186_s3 + $0x2b8] sm:$0xff]  ;;  %v209_v49 = vld [vmem:[%s1186_s3 + $0x2b0] sm:$0xff] }
  0x1d   :  { %345 = vmatprep.subr.mxu0 %v224_v40  ;;  %295 = vmatpush1.msra.mxu1 %v151_v41  ;;  %v203_v50 = vld [vmem:[%s1186_s3 + $0x280] sm:$0xff]  ;;  %v202_v51 = vld [vmem:[%s1186_s3 + $0x278] sm:$0xff]  ;;  %v196_v52 = vld [vmem:[%s1186_s3 + $0x248] sm:$0xff] }
  0x1e   :  { %346 = vmatpush1.msra.mxu0 %v223_v42  ;;  %296 = vmatprep.subr.mxu1 %v145_v43  ;;  %v195_v53 = vld [vmem:[%s1186_s3 + $0x240] sm:$0xff]  ;;  %v189_v54 = vld [vmem:[%s1186_s3 + $0x210] sm:$0xff]  ;;  %v188_v55 = vld [vmem:[%s1186_s3 + $0x208] sm:$0xff] }
  0x1f   :  { %347 = vmatprep.subr.mxu0 %v217_v44  ;;  %297 = vmatpush1.msra.mxu1 %v144_v45  ;;  %v182_v56 = vld [vmem:[%s1186_s3 + $0x1d8] sm:$0xff]  ;;  %v181_v57 = vld [vmem:[%s1186_s3 + $0x1d0] sm:$0xff]  ;;  %v175_v58 = vld [vmem:[%s1186_s3 + $0x1a0] sm:$0xff] }
  0x20   :  { %348 = vmatpush1.msra.mxu0 %v216_v46  ;;  %298 = vmatprep.subr.mxu1 %v138_v47  ;;  %v174_v59 = vld [vmem:[%s1186_s3 + $0x198] sm:$0xff]  ;;  %v168_v60 = vld [vmem:[%s1186_s3 + $0x168] sm:$0xff]  ;;  %v167_v61 = vld [vmem:[%s1186_s3 + $0x160] sm:$0xff] }
  0x21   :  { %349 = vmatprep.subr.mxu0 %v210_v48  ;;  %407 = vmatprep.mubr.f32.mxu0 %v721_v1  ;;  %v161_v62 = vld [vmem:[%s1186_s3 + $0x130] sm:$0xff]  ;;  %v160_v63 = vld [vmem:[%s1186_s3 + $0x128] sm:$0xff]  ;;  %v154_v0 = vld [vmem:[%s1186_s3 + $0xf8] sm:$0xff] }
  0x22   :  { %350 = vmatpush1.msra.mxu0 %v209_v49  ;;  %v153_v2 = vld [vmem:[%s1186_s3 + $0xf0] sm:$0xff]  ;;  %v147_v3 = vld [vmem:[%s1186_s3 + $0xc0] sm:$0xff]  ;;  %v146_v4 = vld [vmem:[%s1186_s3 + $0xb8] sm:$0xff] }
  0x23   :  { %351 = vmatprep.subr.mxu0 %v203_v50  ;;  %v140_v5 = vld [vmem:[%s1186_s3 + $0x88] sm:$0xff]  ;;  %v137_v6 = vld [vmem:[%s1186_s3 + $0x70] sm:$0xff]  ;;  %v139_v7 = vld [vmem:[%s1186_s3 + $0x80] sm:$0xff] }
  0x24   :  { %352 = vmatpush1.msra.mxu0 %v202_v51  ;;  %299 = vmatpush1.msra.mxu1 %v137_v6  ;;  %v131_v8 = vld [vmem:[%s1186_s3 + $0x40] sm:$0xff]  ;;  %v133_v9 = vld [vmem:[%s1186_s3 + $0x50] sm:$0xff]  ;;  %v130_v10 = vld [vmem:[%s1186_s3 + $0x38] sm:$0xff] }
  0x25   :  { %353 = vmatprep.subr.mxu0 %v196_v52  ;;  %300 = vmatprep.subr.mxu1 %v131_v8  ;;  %v132_v11 = vld [vmem:[%s1186_s3 + $0x48] sm:$0xff]  ;;  %v126_v13 = vld [vmem:[%s1186_s3 + $0x18] sm:$0xff]  ;;  %v123_v14 = vld [vmem:[%s1186_s3] sm:$0xff] }
  0x26   :  { %354 = vmatpush1.msra.mxu0 %v195_v53  ;;  %301 = vmatpush1.msra.mxu1 %v130_v10  ;;  %v124_v12 = vld [vmem:[%s1186_s3 + $0x8] sm:$0xff]  ;;  %v125_v15 = vld [vmem:[%s1186_s3 + $0x10] sm:$0xff]  ;;  %v584_v17 = vld [vmem:[%s1185_s2] ss:$0 sm:$0xff] }
  0x27   :  { %355 = vmatprep.subr.mxu0 %v189_v54  ;;  %302 = vmatprep.subr.mxu1 %v124_v12  ;;  %v233_v16 = vld [vmem:[%s1186_s3 + $0x370] sm:$0xff]  ;;  %v232_v22 = vld [vmem:[%s1186_s3 + $0x368] sm:$0xff]  ;;  %v234_v23 = vld [vmem:[%s1186_s3 + $0x378] sm:$0xff] }
  0x28   :  { %356 = vmatpush1.msra.mxu0 %v188_v55  ;;  %303 = vmatpush1.msra.mxu1 %v123_v14  ;;  %v226_v25 = vld [vmem:[%s1186_s3 + $0x338] sm:$0xff]  ;;  %v225_v26 = vld [vmem:[%s1186_s3 + $0x330] sm:$0xff]  ;;  %v227_v27 = vld [vmem:[%s1186_s3 + $0x340] sm:$0xff] }
  0x29   :  { %357 = vmatprep.subr.mxu0 %v182_v56  ;;  %414 = vmatprep.subr.mxu1 %v233_v16  ;;  %v219_v28 = vld [vmem:[%s1186_s3 + $0x300] sm:$0xff]  ;;  %v218_v29 = vld [vmem:[%s1186_s3 + $0x2f8] sm:$0xff]  ;;  %v220_v30 = vld [vmem:[%s1186_s3 + $0x308] sm:$0xff] }
  0x2a   :  { %358 = vmatpush1.msra.mxu0 %v181_v57  ;;  %v212_v31 = vld [vmem:[%s1186_s3 + $0x2c8] sm:$0xff]  ;;  %v211_v32 = vld [vmem:[%s1186_s3 + $0x2c0] sm:$0xff]  ;;  %v213_v33 = vld [vmem:[%s1186_s3 + $0x2d0] sm:$0xff] }
  0x2b   :  { %359 = vmatprep.subr.mxu0 %v175_v58  ;;  %v205_v34 = vld [vmem:[%s1186_s3 + $0x290] sm:$0xff]  ;;  %v204_v35 = vld [vmem:[%s1186_s3 + $0x288] sm:$0xff]  ;;  %v206_v36 = vld [vmem:[%s1186_s3 + $0x298] sm:$0xff] }
  0x2c   :  { %360 = vmatpush1.msra.mxu0 %v174_v59  ;;  %v198_v37 = vld [vmem:[%s1186_s3 + $0x258] sm:$0xff]  ;;  %v197_v38 = vld [vmem:[%s1186_s3 + $0x250] sm:$0xff]  ;;  %v199_v39 = vld [vmem:[%s1186_s3 + $0x260] sm:$0xff] }
  0x2d   :  { %361 = vmatprep.subr.mxu0 %v168_v60  ;;  %v191_v40 = vld [vmem:[%s1186_s3 + $0x220] sm:$0xff]  ;;  %v190_v41 = vld [vmem:[%s1186_s3 + $0x218] sm:$0xff]  ;;  %v192_v42 = vld [vmem:[%s1186_s3 + $0x228] sm:$0xff] }
  0x2e   :  { %362 = vmatpush1.msra.mxu0 %v167_v61  ;;  %v184_v43 = vld [vmem:[%s1186_s3 + $0x1e8] sm:$0xff]  ;;  %v183_v44 = vld [vmem:[%s1186_s3 + $0x1e0] sm:$0xff]  ;;  %v185_v45 = vld [vmem:[%s1186_s3 + $0x1f0] sm:$0xff] }
  0x2f   :  { %363 = vmatprep.subr.mxu0 %v161_v62  ;;  %v177_v46 = vld [vmem:[%s1186_s3 + $0x1b0] sm:$0xff]  ;;  %v176_v47 = vld [vmem:[%s1186_s3 + $0x1a8] sm:$0xff]  ;;  %v178_v48 = vld [vmem:[%s1186_s3 + $0x1b8] sm:$0xff] }
  0x30   :  { %364 = vmatpush1.msra.mxu0 %v160_v63  ;;  %v170_v49 = vld [vmem:[%s1186_s3 + $0x178] sm:$0xff]  ;;  %v169_v50 = vld [vmem:[%s1186_s3 + $0x170] sm:$0xff]  ;;  %v171_v51 = vld [vmem:[%s1186_s3 + $0x180] sm:$0xff] }
  0x31   :  { %365 = vmatprep.subr.mxu0 %v154_v0  ;;  %v163_v52 = vld [vmem:[%s1186_s3 + $0x140] sm:$0xff]  ;;  %v162_v53 = vld [vmem:[%s1186_s3 + $0x138] sm:$0xff]  ;;  %v164_v54 = vld [vmem:[%s1186_s3 + $0x148] sm:$0xff] }
  0x32   :  { %366 = vmatpush1.msra.mxu0 %v153_v2  ;;  %v156_v55 = vld [vmem:[%s1186_s3 + $0x108] sm:$0xff]  ;;  %v155_v56 = vld [vmem:[%s1186_s3 + $0x100] sm:$0xff]  ;;  %v157_v57 = vld [vmem:[%s1186_s3 + $0x110] sm:$0xff] }
  0x33   :  { %367 = vmatprep.subr.mxu0 %v147_v3  ;;  %v149_v58 = vld [vmem:[%s1186_s3 + $0xd0] sm:$0xff]  ;;  %v148_v59 = vld [vmem:[%s1186_s3 + $0xc8] sm:$0xff]  ;;  %v150_v60 = vld [vmem:[%s1186_s3 + $0xd8] sm:$0xff] }
  0x34   :  { %368 = vmatpush1.msra.mxu0 %v146_v4  ;;  %v142_v61 = vld [vmem:[%s1186_s3 + $0x98] sm:$0xff]  ;;  %v141_v62 = vld [vmem:[%s1186_s3 + $0x90] sm:$0xff]  ;;  %v143_v63 = vld [vmem:[%s1186_s3 + $0xa0] sm:$0xff] }
  0x35   :  { %369 = vmatprep.subr.mxu0 %v140_v5  ;;  %v135_v0 = vld [vmem:[%s1186_s3 + $0x60] sm:$0xff]  ;;  %v134_v2 = vld [vmem:[%s1186_s3 + $0x58] sm:$0xff]  ;;  %v136_v3 = vld [vmem:[%s1186_s3 + $0x68] sm:$0xff] }
  0x36   :  { %370 = vmatpush1.msra.mxu0 %v139_v7  ;;  %v128_v4 = vld [vmem:[%s1186_s3 + $0x28] sm:$0xff]  ;;  %v127_v5 = vld [vmem:[%s1186_s3 + $0x20] sm:$0xff]  ;;  %v129_v6 = vld [vmem:[%s1186_s3 + $0x30] sm:$0xff]  ;;  %v237_v7 = vlaneseq }
  0x37   :  { %371 = vmatprep.subr.mxu0 %v133_v9 }
  0x38   :  { %372 = vmatpush1.msra.mxu0 %v132_v11  ;;  %v238_v8 = vshrl.u32 %v237_v7, 7  ;;  %v235_v11 = vld [vmem:[%s1187_s4] sm:$0x7f]  ;;  %s723_s4 = smov [#allocation2]  }
  0x39   :  { %373 = vmatprep.subr.mxu0 %v126_v13  ;;  %s576_s30 = sshll.u32 %s723_s4, 4  ;;  %s577_s30 = int_to_ptr.vmem [resolvable:$true] %s576_s30 }
  0x3a   :  { %374 = vmatpush1.msra.mxu0 %v125_v15  ;;  %v239_v9 = vsub.s32 0, %v238_v8  ;;  %v247_v10 = vsub.s32 2, %v238_v8  ;;  %v243_v12 = vsub.s32 1, %v238_v8  ;;  %v251_v13 = vsub.s32 3, %v238_v8  ;;  %s699_s6 = scalar_lea.vmem %s577_s30, 896  ;;  %p704_p1 = scmp.lt.s32.totalorder %s577_s30, %s577_s30 }
  0x3b   :  { %647 = vmatprep.subr.mxu0 %v721_v1  ;;  %p700_p0 = scmp.ne.s32.totalorder %s577_s30, %s699_s6  ;;  %p705_p2 = scmp.lt.s32.totalorder %s699_s6, %s699_s6 }
  0x3c   :  { %v240_v14 = vrot.slane %v235_v11, %v239_v9  ;;  %v248_v15 = vrot.slane %v235_v11, %v247_v10  ;;  %v244_v16 = vrot.slane %v235_v11, %v243_v12 }
  0x3d   :  { %p706_p3 = por %p705_p2, %p704_p1 }
  0x3f   :  { %p707_p4 = pnand %p706_p3, %p700_p0 }
  0xdb   :  { %v116_v18 = vpop.f32.mrf.mxu0 }
  0xdc   :  { %v117_v19 = vadd.f32 %v584_v17, %v116_v18  ;;  %v252_v17 = vrot.slane %v235_v11, %v251_v13 }
  0xdd   :  { %v646_v20 = vpop.f32.mrf.mxu0 }
  0xde   :  { %vm120_vm3 = vcmp.gt.f32.partialorder %v117_v19, 0.0  ;;  %v121_v21 = vmul.f32 0.2, %v117_v19 }
  0xe0   :  { %v1018_v24 = vsel %vm120_vm3, %v117_v19, %v121_v21 }
  0xe1   :  { %337 = vmatmul.mubr.f32.vlgmr.msra.gmra.mxu1 %v1018_v24  ;;  %408 = vmatmul.mubr.f32.vlgmr.msra.gmra.mxu0 %v1018_v24 }
  0xe2   :  { %415 = vmatpush1.msra.mxu1 %v232_v22  ;;  %648 = vmatpush3.msra.mxu0 %v234_v23 }
  0xe3   :  { %416 = vmatprep.subr.mxu1 %v226_v25  ;;  %649 = vmatprep.subr.mxu0 %v721_v1 }
  0xe4   :  { %417 = vmatpush1.msra.mxu1 %v225_v26  ;;  %650 = vmatpush3.msra.mxu0 %v227_v27 }
  0xe5   :  { %418 = vmatprep.subr.mxu1 %v219_v28  ;;  %651 = vmatprep.subr.mxu0 %v721_v1 }
  0xe6   :  { %419 = vmatpush1.msra.mxu1 %v218_v29  ;;  %652 = vmatpush3.msra.mxu0 %v220_v30  ;;  %v255_v29 = vsub.s32 4, %v238_v8  ;;  %v263_v30 = vsub.s32 6, %v238_v8 }
  0xe7   :  { %420 = vmatprep.subr.mxu1 %v212_v31  ;;  %653 = vmatprep.subr.mxu0 %v721_v1  ;;  %v259_v31 = vsub.s32 5, %v238_v8 }
  0xe8   :  { %421 = vmatpush1.msra.mxu1 %v211_v32  ;;  %654 = vmatpush3.msra.mxu0 %v213_v33  ;;  %v256_v32 = vrot.slane %v235_v11, %v255_v29  ;;  %v264_v33 = vrot.slane %v235_v11, %v263_v30 }
  0xe9   :  { %422 = vmatprep.subr.mxu1 %v205_v34  ;;  %655 = vmatprep.subr.mxu0 %v721_v1  ;;  %v260_v34 = vrot.slane %v235_v11, %v259_v31 }
  0xea   :  { %423 = vmatpush1.msra.mxu1 %v204_v35  ;;  %656 = vmatpush3.msra.mxu0 %v206_v36 }
  0xeb   :  { %424 = vmatprep.subr.mxu1 %v198_v37  ;;  %657 = vmatprep.subr.mxu0 %v721_v1 }
  0xec   :  { %425 = vmatpush1.msra.mxu1 %v197_v38  ;;  %658 = vmatpush3.msra.mxu0 %v199_v39 }
  0xed   :  { %426 = vmatprep.subr.mxu1 %v191_v40  ;;  %659 = vmatprep.subr.mxu0 %v721_v1 }
  0xee   :  { %427 = vmatpush1.msra.mxu1 %v190_v41  ;;  %660 = vmatpush3.msra.mxu0 %v192_v42 }
  0xef   :  { %428 = vmatprep.subr.mxu1 %v184_v43  ;;  %661 = vmatprep.subr.mxu0 %v721_v1 }
  0xf0   :  { %429 = vmatpush1.msra.mxu1 %v183_v44  ;;  %662 = vmatpush3.msra.mxu0 %v185_v45 }
  0xf1   :  { %430 = vmatprep.subr.mxu1 %v177_v46  ;;  %663 = vmatprep.subr.mxu0 %v721_v1 }
  0xf2   :  { %431 = vmatpush1.msra.mxu1 %v176_v47  ;;  %664 = vmatpush3.msra.mxu0 %v178_v48 }
  0xf3   :  { %432 = vmatprep.subr.mxu1 %v170_v49  ;;  %665 = vmatprep.subr.mxu0 %v721_v1 }
  0xf4   :  { %433 = vmatpush1.msra.mxu1 %v169_v50  ;;  %666 = vmatpush3.msra.mxu0 %v171_v51 }
  0xf5   :  { %434 = vmatprep.subr.mxu1 %v163_v52  ;;  %667 = vmatprep.subr.mxu0 %v721_v1 }
  0xf6   :  { %435 = vmatpush1.msra.mxu1 %v162_v53  ;;  %668 = vmatpush3.msra.mxu0 %v164_v54 }
  0xf7   :  { %436 = vmatprep.subr.mxu1 %v156_v55  ;;  %669 = vmatprep.subr.mxu0 %v721_v1 }
  0xf8   :  { %437 = vmatpush1.msra.mxu1 %v155_v56  ;;  %670 = vmatpush3.msra.mxu0 %v157_v57 }
  0xf9   :  { %438 = vmatprep.subr.mxu1 %v149_v58  ;;  %671 = vmatprep.subr.mxu0 %v721_v1 }
  0xfa   :  { %439 = vmatpush1.msra.mxu1 %v148_v59  ;;  %672 = vmatpush3.msra.mxu0 %v150_v60 }
  0xfb   :  { %440 = vmatprep.subr.mxu1 %v142_v61  ;;  %673 = vmatprep.subr.mxu0 %v721_v1 }
  0xfc   :  { %441 = vmatpush1.msra.mxu1 %v141_v62  ;;  %674 = vmatpush3.msra.mxu0 %v143_v63 }
  0xfd   :  { %442 = vmatprep.subr.mxu1 %v135_v0  ;;  %675 = vmatprep.subr.mxu0 %v721_v1 }
  0xfe   :  { %443 = vmatpush1.msra.mxu1 %v134_v2  ;;  %676 = vmatpush3.msra.mxu0 %v136_v3 }
  0xff   :  { %444 = vmatprep.subr.mxu1 %v128_v4  ;;  %677 = vmatprep.subr.mxu0 %v721_v1 }
 0x100   :  { %445 = vmatpush1.msra.mxu1 %v127_v5  ;;  %478 = vmatprep.mubr.f32.mxu1 %v721_v1 }
 0x101   :  { %678 = vmatpush3.msra.mxu0 %v129_v6  ;;  %679 = vmatprep.mubr.msk.f32.mxu0 %vm722_vm1, %v721_v1 }
 0x102   :  { %479 = vmatmul.mubr.f32.vlgmr.msra.gmra.mxu1 %v1018_v24  ;;  %680 = vmatmul.mubr.f32.vlgmr.msra.gmra.mxu0 %v1018_v24 }
 0x1a1   :  { %v338_v18 = vpop.f32.mrf.mxu1  ;;  %v409_v1 = vpop.f32.mrf.mxu0 }
 0x1a2   :  { %v339_v19 = vadd.f32 %v338_v18, %v240_v14  ;;  %v410_v20 = vadd.f32 %v409_v1, %v248_v15 }
 0x1a3   :  { %v340_v21 = vpop.f32.mrf.mxu1  ;;  %v411_v22 = vpop.f32.mrf.mxu0 }
 0x1a4   :  { %685 = vtanh.f32 %v339_v19  ;;  %v341_v23 = vadd.f32 %v340_v21, %v244_v16  ;;  %v412_v24 = vadd.f32 %v411_v22, %v252_v17 }
 0x1a5   :  { %687 = vtanh.f32 %v410_v20 }
 0x1a6   :  { %689 = vtanh.f32 %v341_v23 }
 0x1a7   :  { %691 = vtanh.f32 %v412_v24 }
 0x1b1   :  { %v686_v25 = vpop.eup %685 }
 0x1b2   :  { %v688_v26 = vpop.eup %687  ;;  %562 = vst [vmem:[#allocation2] sm:$0xff] %v686_v25 }
 0x1b3   :  { %v690_v27 = vpop.eup %689  ;;  %564 = vst [vmem:[#allocation2 + $0x10] sm:$0xff] %v688_v26 }
 0x1b4   :  { %v692_v28 = vpop.eup %691  ;;  %563 = vst [vmem:[#allocation2 + $0x8] sm:$0xff] %v690_v27 }
 0x1b5   :  { %565 = vst [vmem:[#allocation2 + $0x18] sm:$0xff] %v692_v28 }
 0x1c2   :  { %v480_v35 = vpop.f32.mrf.mxu1  ;;  %v551_v36 = vpop.f32.mrf.mxu0 }
 0x1c3   :  { %v481_v37 = vadd.f32 %v480_v35, %v256_v32  ;;  %v552_v38 = vadd.f32 %v551_v36, %v264_v33 }
 0x1c4   :  { %v482_v39 = vpop.f32.mrf.mxu1  ;;  %v681_v40 = vpop.f32.mrf.mxu0 }
 0x1c5   :  { %693 = vtanh.f32 %v481_v37  ;;  %v483_v41 = vadd.f32 %v482_v39, %v260_v34 }
 0x1c6   :  { %695 = vtanh.f32 %v552_v38 }
 0x1c7   :  { %697 = vtanh.f32 %v483_v41 }
 0x1d2   :  { %v694_v42 = vpop.eup %693 }
 0x1d3   :  { %v696_v43 = vpop.eup %695  ;;  %566 = vst [vmem:[#allocation2 + $0x20] sm:$0xff] %v694_v42 }
 0x1d4   :  { %v698_v44 = vpop.eup %697  ;;  %569 = vst.msk [vmem:[#allocation2 + $0x30] sm:$0xff] %vm568_vm4, %v696_v43 }
 0x1d5   :  { %567 = vst [vmem:[#allocation2 + $0x28] sm:$0xff] %v698_v44 }
 0x1d6   :  { %710 = shalt.err (!%p707_p4)
}
 0x1d7   :  { %579 = dma.vmem_to_hbm [thread:$0]  %s577_s30, 896, %s1188_s5, [#allocation3]  }
 0x1d8   :  { %719 = dma.done.wait [#allocation3], 896  }
 0x1d9   :  { %720 = vsyncadd [#allocation3], 4294966400 }
 0x1da   :  { %583 = vsyncpa [#allocation3], 1 }

</bundles_post_ra>
